<compile_context>
chip_gen: v6e
topology: v6e:2x2x1
jax: 0.10.0
libtpu: 0.0.40
codegen_flags: <defaults>
</compile_context>

<pallas_src>
import math

import jax
import jax.numpy as jnp
from jax.experimental import pallas as pl
from jax.experimental.pallas import tpu as pltpu


def _fourier_kernel(x_ref, f_ref, o_ref):
    # x_ref: (TB, D) input tile
    # f_ref: (1, D*F) freqs tiled so f[0, i*F + j] = freqs[j]
    # o_ref: (TB, 2*D*F) lane-dense output tile: [sin | cos]
    x = x_ref[...].astype(jnp.float32)              # (TB, D)
    f = f_ref[...].astype(jnp.float32)              # (1, D*F)
    _, D = x_ref.shape
    DF = f_ref.shape[1]
    F = DF // D

    # Lane-dense projection: proj[:, i*F + j] = x[:, i] * freqs[j].
    # Unrolled over the (small) feature dim D; each piece is a lane-broadcast
    # multiply, then one lane concatenation -> (TB, D*F).
    pieces = [x[:, i:i + 1] * f[:, i * F:(i + 1) * F] for i in range(D)]
    proj = jnp.concatenate(pieces, axis=-1)          # (TB, D*F)

    # Single sin + single cos over the dense slab, one full-block store.
    out = jnp.concatenate([jnp.sin(proj), jnp.cos(proj)], axis=-1)  # (TB, 2*D*F)
    o_ref[...] = out.astype(o_ref.dtype)


def fourier_features(x, freqs, *, out_dtype=None,
                     vmem_limit_bytes=32 * 1024 * 1024,
                     max_tb=8192):
    """Pallas implementation of FourierFeatures.forward.

    x:     (..., D) float array
    freqs: (F,)     float array  (module param: 1.0 * arange(min_freq, max_freq + 1))
    returns (..., 2 * D * F) in `out_dtype` (default: x.dtype). Math is f32;
    pass out_dtype=jnp.bfloat16 to halve HBM write traffic on this
    write-bound kernel.
    """
    *lead, D = x.shape
    B = math.prod(lead) if lead else 1
    F = int(freqs.shape[0])
    DF = D * F
    out_dtype = jnp.dtype(x.dtype if out_dtype is None else out_dtype)

    x2d = x.reshape(B, D)
    # Pre-tile freqs so the kernel's lane axis is D*F: f_tiled[i*F + j] = freqs[j].
    f_tiled = jnp.tile(freqs.astype(jnp.float32), D).reshape(1, DF)

    # --- choose batch tile tb from the VMEM budget ------------------------
    # Double-buffered input + output tiles must fit in ~half the VMEM limit.
    in_bytes_row = D * jnp.dtype(x2d.dtype).itemsize
    out_bytes_row = 2 * DF * out_dtype.itemsize
    bytes_per_row = in_bytes_row + out_bytes_row
    budget = vmem_limit_bytes // 2                   # headroom for pipeline/etc.
    tb = budget // (2 * bytes_per_row)               # 2 = double buffering
    tb = min(tb, max_tb, ((B + 7) // 8) * 8)         # don't exceed (padded) batch
    tb = max(8, (tb // 8) * 8)                       # sublane-aligned

    # Ragged batch: pad rows up to a multiple of tb, slice off afterwards.
    Bp = ((B + tb - 1) // tb) * tb
    if Bp != B:
        x2d = jnp.pad(x2d, ((0, Bp - B), (0, 0)))

    out = pl.pallas_call(
        _fourier_kernel,
        out_shape=jax.ShapeDtypeStruct((Bp, 2 * DF), out_dtype),
        grid=(Bp // tb,),
        in_specs=[
            pl.BlockSpec((tb, D), lambda i: (i, 0)),    # batch tile of x
            pl.BlockSpec((1, DF), lambda i: (0, 0)),    # tiled freqs, grid-invariant
        ],
        out_specs=pl.BlockSpec((tb, 2 * DF), lambda i: (i, 0)),
        compiler_params=pltpu.CompilerParams(
            dimension_semantics=("parallel",),          # megacore split on v7x
            vmem_limit_bytes=vmem_limit_bytes,
        ),
    )(x2d, f_tiled)

    if Bp != B:
        out = out[:B]
    return out.reshape(*lead, 2 * DF)


def fourier_features_ref(x, freqs):
    """Pure-JAX reference mirroring the PyTorch forward."""
    proj = x[..., :, None].astype(jnp.float32) * freqs.astype(jnp.float32)
    sin_val = jnp.sin(proj).reshape(*x.shape[:-1], -1)
    cos_val = jnp.cos(proj).reshape(*x.shape[:-1], -1)
    return jnp.concatenate([sin_val, cos_val], axis=-1)


if __name__ == "__main__":
    # Deterministic parameter init per module __init__: freqs = 1.0 * arange(1, 11)
    min_frequency, max_frequency = 1, 10
    freqs = jnp.arange(min_frequency, max_frequency + 1, dtype=jnp.float32)  # (10,)

    # Small example input: leading dims (2, 8), feature dim 4.
    key = jax.random.PRNGKey(0)
    x = jax.random.normal(key, (2, 8, 4), dtype=jnp.float32)

    ref = fourier_features_ref(x, freqs)

    # f32 output path.
    out = fourier_features(x, freqs)
    out = jax.block_until_ready(out)
    assert out.shape == (2, 8, 2 * 4 * freqs.shape[0])
    assert jnp.allclose(out, ref, rtol=1e-5, atol=1e-5), "f32 mismatch vs reference"

    # bf16 output path (halves HBM write traffic on this write-bound kernel).
    out_bf16 = fourier_features(x, freqs, out_dtype=jnp.bfloat16)
    out_bf16 = jax.block_until_ready(out_bf16)
    assert jnp.allclose(out_bf16.astype(jnp.float32), ref, rtol=2e-2, atol=2e-2), \
        "bf16 mismatch vs reference"

    print("KERNEL_OK")
</pallas_src>

<mosaic_0001>
module attributes {stable_mosaic.version = 11 : i64} {
  func.func @_fourier_kernel(%arg0: i32, %arg1: memref<16x4xf32, #tpu.memory_space<vmem>>, %arg2: memref<1x40xf32, #tpu.memory_space<vmem>>, %arg3: memref<16x80xf32, #tpu.memory_space<vmem>>) attributes {dimension_semantics = [#tpu.dimension_semantics<parallel>], iteration_bounds = array<i64: 1>, scalar_prefetch = 0 : i64, scratch_operands = 0 : i64, tpu.core_type = #tpu.core_type<tc>, window_params = [{transform_indices = @transform_0, window_bounds = array<i64: 16, 4>}, {pipeline_mode = #tpu.pipeline_mode<synchronous>, transform_indices = @transform_1, window_bounds = array<i64: 1, 40>}, {transform_indices = @transform_2, window_bounds = array<i64: 16, 80>}]} {
    %c0 = arith.constant 0 : index
    %c0_0 = arith.constant 0 : index
    %0 = vector.load %arg1[%c0, %c0_0] : memref<16x4xf32, #tpu.memory_space<vmem>>, vector<16x4xf32>
    %c0_1 = arith.constant 0 : index
    %c0_2 = arith.constant 0 : index
    %1 = vector.load %arg2[%c0_1, %c0_2] : memref<1x40xf32, #tpu.memory_space<vmem>>, vector<1x40xf32>
    %2 = vector.extract_strided_slice %0 {offsets = [0, 0], sizes = [16, 1], strides = [1, 1]} : vector<16x4xf32> to vector<16x1xf32>
    %3 = vector.extract_strided_slice %1 {offsets = [0, 0], sizes = [1, 10], strides = [1, 1]} : vector<1x40xf32> to vector<1x10xf32>
    %4 = vector.broadcast %2 : vector<16x1xf32> to vector<16x10xf32>
    %5 = vector.broadcast %3 : vector<1x10xf32> to vector<16x10xf32>
    %6 = arith.mulf %4, %5 : vector<16x10xf32>
    %7 = vector.extract_strided_slice %0 {offsets = [0, 1], sizes = [16, 1], strides = [1, 1]} : vector<16x4xf32> to vector<16x1xf32>
    %8 = vector.extract_strided_slice %1 {offsets = [0, 10], sizes = [1, 10], strides = [1, 1]} : vector<1x40xf32> to vector<1x10xf32>
    %9 = vector.broadcast %7 : vector<16x1xf32> to vector<16x10xf32>
    %10 = vector.broadcast %8 : vector<1x10xf32> to vector<16x10xf32>
    %11 = arith.mulf %9, %10 : vector<16x10xf32>
    %12 = vector.extract_strided_slice %0 {offsets = [0, 2], sizes = [16, 1], strides = [1, 1]} : vector<16x4xf32> to vector<16x1xf32>
    %13 = vector.extract_strided_slice %1 {offsets = [0, 20], sizes = [1, 10], strides = [1, 1]} : vector<1x40xf32> to vector<1x10xf32>
    %14 = vector.broadcast %12 : vector<16x1xf32> to vector<16x10xf32>
    %15 = vector.broadcast %13 : vector<1x10xf32> to vector<16x10xf32>
    %16 = arith.mulf %14, %15 : vector<16x10xf32>
    %17 = vector.extract_strided_slice %0 {offsets = [0, 3], sizes = [16, 1], strides = [1, 1]} : vector<16x4xf32> to vector<16x1xf32>
    %18 = vector.extract_strided_slice %1 {offsets = [0, 30], sizes = [1, 10], strides = [1, 1]} : vector<1x40xf32> to vector<1x10xf32>
    %19 = vector.broadcast %17 : vector<16x1xf32> to vector<16x10xf32>
    %20 = vector.broadcast %18 : vector<1x10xf32> to vector<16x10xf32>
    %21 = arith.mulf %19, %20 : vector<16x10xf32>
    %22 = tpu.concatenate %6, %11, %16, %21 in 1 : vector<16x10xf32>, vector<16x10xf32>, vector<16x10xf32>, vector<16x10xf32> -> vector<16x40xf32>
    %23 = math.sin %22 : vector<16x40xf32>
    %24 = math.cos %22 : vector<16x40xf32>
    %25 = tpu.concatenate %23, %24 in 1 : vector<16x40xf32>, vector<16x40xf32> -> vector<16x80xf32>
    %c0_3 = arith.constant 0 : index
    %c0_4 = arith.constant 0 : index
    %26 = vector.load %arg3[%c0_3, %c0_4] : memref<16x80xf32, #tpu.memory_space<vmem>>, vector<16x80xf32>
    tpu.vector_store %arg3[%c0_3, %c0_4], %25 {strides = array<i32>} : memref<16x80xf32, #tpu.memory_space<vmem>>, vector<16x80xf32>,
    return
  }
  func.func @transform_0(%arg0: i32) -> (i32, i32) {
    %c0_i32 = arith.constant 0 : i32
    %c0_i32_0 = arith.constant 0 : i32
    return %arg0, %c0_i32 : i32, i32
  }
  func.func @transform_1(%arg0: i32) -> (i32, i32) {
    %c0_i32 = arith.constant 0 : i32
    %c0_i32_0 = arith.constant 0 : i32
    %c0_i32_1 = arith.constant 0 : i32
    return %c0_i32, %c0_i32_0 : i32, i32
  }
  func.func @transform_2(%arg0: i32) -> (i32, i32) {
    %c0_i32 = arith.constant 0 : i32
    %c0_i32_0 = arith.constant 0 : i32
    return %arg0, %c0_i32 : i32, i32
  }
}

</mosaic_0001>

<bundles_post_ra>
// kernel: tpu_custom_call.1
= control target key start
LH: loop header
LB: loop body
LE: loop exit
PB: predicated region body
PF: predicated region fallthrough
CT: control target
= control target key end

     0   :  { %v591_v1 = vmov 1   ;;  %v592_v2 = vmov 0   ;;  %s694_s0 = inlined_call_operand.vmem [shape: f32[16,4], index: 0, kind: input, shape index: {}]   ;;  %s695_s1 = inlined_call_operand.vmem [shape: f32[1,40], index: 1, kind: input, shape index: {}]   ;;  %s696_s2 = inlined_call_operand.hbm [shape: f32[16,80], index: 2, kind: output, shape index: {}]  }
   0x1   :  { %v12_v0 = vld [vmem:[%s694_s0] sm:$0xff]  ;;  %556 = vset.pattern.permute.xlu1 %v591_v1  ;;  %555 = vset.pattern.permute.xlu0 %v592_v2 }
   0x2   :  { %7 = vsyncpa [#allocation3], 0  ;;  %34 = vperm.xlu1 %556, %v12_v0   ;;  %17 = vperm.xlu0 %555, %v12_v0   ;;  %v13_v3 = vld [vmem:[%s694_s0 + $0x8] sm:$0xff]  ;;  %v593_v4 = vmov 2   ;;  %v594_v5 = vmov 3   ;;  %vm63_vm0 = vcmask 80896  }
   0x3   :  { %v516_v10 = vld [vmem:[%s695_s1] ss:$0 sm:$0xff]  ;;  %vm66_vm1 = vcmask 162816   ;;  %vm69_vm2 = vcmask 244736   ;;  %v595_v49 = vmov 683565275  }
   0x4   :  { %v596_v53 = vmov 2475754826   ;;  %v597_v55 = vmov 2131351028   ;;  %v598_v57 = vmov 2102212464  }
   0x5   :  { %v599_v59 = vmov 920167782   ;;  %v600_v2 = vmov 1326507024   ;;  %s601_s0 = smov 40   ;;  %s602_s1 = smov [#allocation2]  }
   0x6   :  { %38 = vperm.xlu1 %556, %v13_v3   ;;  %22 = vperm.xlu0 %555, %v13_v3   ;;  %s505_s15 = sshll.u32 %s602_s1, 4  ;;  %s506_s15 = int_to_ptr.vmem [resolvable:$true] %s505_s15 }
   0x7   :  { %s569_s16 = scalar_lea.vmem %s506_s15, 256  ;;  %p574_p1 = scmp.lt.s32.totalorder %s506_s15, %s506_s15 }
   0x8   :  { %p570_p0 = scmp.ne.s32.totalorder %s506_s15, %s569_s16  ;;  %p575_p2 = scmp.lt.s32.totalorder %s569_s16, %s569_s16 }
   0xa   :  { %558 = vset.pattern.permute.xlu1 %v593_v4  ;;  %557 = vset.pattern.permute.xlu0 %v593_v4  ;;  %p576_p3 = por %p575_p2, %p574_p1 }
   0xb   :  { %48 = vperm.xlu1 %558, %v13_v3   ;;  %44 = vperm.xlu0 %557, %v12_v0  }
   0xc   :  { %p577_p4 = pnand %p576_p3, %p570_p0 }
   0xf   :  { %559 = vset.pattern.permute.xlu1 %v594_v5  ;;  %560 = vset.pattern.permute.xlu0 %v594_v5 }
  0x10   :  { %54 = vperm.xlu1 %559, %v12_v0   ;;  %58 = vperm.xlu0 %560, %v13_v3  }
  0x7d   :  { %v35_v6 = vpop.permute.xlu1 %34  ;;  %v18_v7 = vpop.permute.xlu0 %17 }
  0x7e   :  { %v41_v13 = vmul.f32 %v516_v10, %v35_v6  ;;  %v31_v14 = vmul.f32 %v516_v10, %v18_v7 }
  0x80   :  { %v64_v21 = vsel %vm63_vm0, %v31_v14, %v41_v13 }
  0x81   :  { %v39_v8 = vpop.permute.xlu1 %38  ;;  %v23_v9 = vpop.permute.xlu0 %22 }
  0x82   :  { %v42_v15 = vmul.f32 %v516_v10, %v39_v8  ;;  %v32_v16 = vmul.f32 %v516_v10, %v23_v9 }
  0x84   :  { %v65_v22 = vsel %vm63_vm0, %v32_v16, %v42_v15 }
  0x86   :  { %v49_v11 = vpop.permute.xlu1 %48  ;;  %v45_v12 = vpop.permute.xlu0 %44 }
  0x87   :  { %v52_v17 = vmul.f32 %v516_v10, %v49_v11  ;;  %v51_v18 = vmul.f32 %v516_v10, %v45_v12 }
  0x89   :  { %v68_v25 = vsel %vm66_vm1, %v65_v22, %v52_v17  ;;  %v67_v26 = vsel %vm66_vm1, %v64_v21, %v51_v18 }
  0x8b   :  { %v55_v19 = vpop.permute.xlu1 %54  ;;  %v59_v20 = vpop.permute.xlu0 %58 }
  0x8c   :  { %v61_v23 = vmul.f32 %v516_v10, %v55_v19  ;;  %v62_v24 = vmul.f32 %v516_v10, %v59_v20 }
  0x8e   :  { %v629_v27 = vsel %vm69_vm2, %v67_v26, %v61_v23  ;;  %v631_v28 = vsel %vm69_vm2, %v68_v25, %v62_v24 }
  0x8f   :  { %v72_v29 = vand.u32 2147483647, %v629_v27  ;;  %v75_v30 = vand.u32 2139095040, %v629_v27  ;;  %v179_v31 = vand.u32 2139095040, %v631_v28  ;;  %v176_v34 = vand.u32 2147483647, %v631_v28 }
  0x90   :  { %vm74_vm1 = vcmp.lt.s32.totalorder %v629_v27, 0 }
  0x91   :  { %v76_v32 = vshrl.u32 %v75_v30, 23  ;;  %v79_v33 = vand.u32 8388607, %v72_v29  ;;  %v180_v35 = vshrl.u32 %v179_v31, 23  ;;  %v641_v40 = vand.u32 8388607, %v176_v34 }
  0x92   :  { %vm73_vm2 = vcmp.le.f32.partialorder %v72_v29, 0.7853982 }
  0x93   :  { %v517_v36 = vadd.s32 4294967169, %v76_v32  ;;  %v521_v37 = vadd.s32 4294967169, %v180_v35  ;;  %v80_v39 = vor.u32 8388608, %v79_v33  ;;  %v184_v47 = vor.u32 8388608, %v641_v40 }
  0x95   :  { %v82_v38 = vadd.s32 1, %v517_v36  ;;  %v186_v41 = vadd.s32 1, %v521_v37  ;;  %v643_v46 = vshll.u32 %v80_v39, 8 }
  0x97   :  { %vm83_vm3 = vcmp.gt.s32.totalorder %v82_v38, 0  ;;  %vm187_vm4 = vcmp.gt.s32.totalorder %v186_v41, 0 }
  0x98   :  { %v84_v42 = vsel %vm83_vm3, %v82_v38, 0  ;;  %v188_v45 = vsel %vm187_vm4, %v186_v41, 0  ;;  %v224_v41 = vshll.u32 %v184_v47, 8  ;;  %vm178_vm3 = vcmp.lt.s32.totalorder %v631_v28, 0 }
  0x99   :  { %v85_v43 = vshrl.u32 %v84_v42, 5  ;;  %v86_v44 = vand.u32 31, %v84_v42  ;;  %v646_v51 = vshrl.u32 %v188_v45, 5  ;;  %v190_v52 = vand.u32 31, %v188_v45 }
  0x9a   :  { %vm177_vm4 = vcmp.le.f32.partialorder %v176_v34, 0.7853982 }
  0x9b   :  { %v87_v48 = vsub.s32 32, %v86_v44  ;;  %v89_v50 = vshll.u32 %v595_v49, %v86_v44  ;;  %v92_v54 = vshll.u32 %v596_v53, %v86_v44  ;;  %v95_v56 = vshll.u32 %v597_v55, %v86_v44 }
  0x9c   :  { %v98_v58 = vshll.u32 %v598_v57, %v86_v44  ;;  %v101_v60 = vshll.u32 %v599_v59, %v86_v44  ;;  %vm104_vm5 = vcmp.lt.s32.totalorder %v85_v43, 1  ;;  %vm105_vm6 = vcmp.lt.s32.totalorder %v85_v43, 2 }
  0x9d   :  { %v90_v61 = vshrl.u32 %v596_v53, %v87_v48  ;;  %v93_v62 = vshrl.u32 %v597_v55, %v87_v48  ;;  %v96_v63 = vshrl.u32 %v598_v57, %v87_v48  ;;  %v88_v0 = vshrl.u32 %v595_v49, %v87_v48 }
  0x9e   :  { %v99_v1 = vshrl.u32 %v599_v59, %v87_v48  ;;  %v102_v3 = vshrl.u32 %v600_v2, %v87_v48  ;;  %v191_v7 = vsub.s32 32, %v190_v52  ;;  %vm106_vm7 = vcmp.lt.s32.totalorder %v85_v43, 3 }
  0x9f   :  { %v91_v4 = vor.u32 %v90_v61, %v89_v50  ;;  %v94_v5 = vor.u32 %v93_v62, %v92_v54  ;;  %v97_v6 = vor.u32 %v96_v63, %v95_v56  ;;  %vm107_vm8 = vcmp.lt.s32.totalorder %v85_v43, 4 }
  0xa0   :  { %v100_v8 = vor.u32 %v99_v1, %v98_v58  ;;  %v103_v9 = vor.u32 %v102_v3, %v101_v60  ;;  %v193_v17 = vshll.u32 %v595_v49, %v190_v52  ;;  %v194_v20 = vshrl.u32 %v596_v53, %v191_v7 }
  0xa1   :  { %v108_v10 = vsel %vm104_vm5, %v88_v0, %v91_v4  ;;  %v109_v11 = vsel %vm107_vm8, %v97_v6, 2102212464  ;;  %v112_v12 = vsel %vm104_vm5, %v91_v4, %v94_v5  ;;  %v116_v13 = vsel %vm104_vm5, %v94_v5, %v97_v6 }
  0xa2   :  { %v110_v14 = vsel %vm106_vm7, %v94_v5, %v109_v11  ;;  %v113_v15 = vsel %vm107_vm8, %v100_v8, 920167782  ;;  %v117_v16 = vsel %vm107_vm8, %v103_v9, 1326507024  ;;  %v196_v21 = vshll.u32 %v596_v53, %v190_v52 }
  0xa3   :  { %v114_v18 = vsel %vm106_vm7, %v97_v6, %v113_v15  ;;  %v118_v19 = vsel %vm106_vm7, %v100_v8, %v117_v16  ;;  %v111_v22 = vsel %vm105_vm6, %v108_v10, %v110_v14  ;;  %v197_v25 = vshrl.u32 %v597_v55, %v191_v7 }
  0xa4   :  { %v115_v23 = vsel %vm105_vm6, %v112_v12, %v114_v18  ;;  %v119_v24 = vsel %vm105_vm6, %v116_v13, %v118_v19  ;;  %v195_v33 = vor.u32 %v194_v20, %v193_v17  ;;  %v199_v36 = vshll.u32 %v597_v55, %v190_v52 }
  0xa5   :  { %v655_v26 = vmul.u32.u64.low %v643_v46, %v119_v24  ;;  %v656_v30 = vmul.u32.u64.high %v643_v46, %v119_v24, %v655_v26  ;;  %v659_v31 = vmul.u32.u64.low %v643_v46, %v115_v23  ;;  %v660_v32 = vmul.u32.u64.high %v643_v46, %v115_v23, %v659_v31 }
  0xa6   :  { %v198_v35 = vor.u32 %v197_v25, %v196_v21  ;;  %v200_v37 = vshrl.u32 %v598_v57, %v191_v7  ;;  %v202_v38 = vshll.u32 %v598_v57, %v190_v52  ;;  %v203_v39 = vshrl.u32 %v599_v59, %v191_v7 }
  0xa7   :  { %v206_v40 = vshrl.u32 %v600_v2, %v191_v7  ;;  %v127_v42 = vmul.u32 %v643_v46, %v111_v22  ;;  %v192_v43 = vshrl.u32 %v595_v49, %v191_v7  ;;  %v205_v45 = vshll.u32 %v599_v59, %v190_v52 }
  0xa8   :  { %v201_v44 = vor.u32 %v200_v37, %v199_v36  ;;  %vm129_vm9 = vc.u32 %v656_v30, %v659_v31  ;;  %v130_v48 = vadd.s32 1, %v660_v32  ;;  %v204_v50 = vor.u32 %v203_v39, %v202_v38 }
  0xa9   :  { %vm208_vm10 = vcmp.lt.s32.totalorder %v646_v51, 1  ;;  %v207_v53 = vor.u32 %v206_v40, %v205_v45  ;;  %vm210_vm11 = vcmp.lt.s32.totalorder %v646_v51, 3  ;;  %vm211_vm12 = vcmp.lt.s32.totalorder %v646_v51, 4 }
  0xaa   :  { %v216_v54 = vsel %vm208_vm10, %v195_v33, %v198_v35  ;;  %v131_v47 = vsel %vm129_vm9, %v130_v48, %v660_v32  ;;  %v213_v55 = vsel %vm211_vm12, %v201_v44, 2102212464  ;;  %v217_v46 = vsel %vm211_vm12, %v204_v50, 920167782 }
  0xab   :  { %v220_v49 = vsel %vm208_vm10, %v198_v35, %v201_v44  ;;  %v132_v56 = vadd.s32 %v131_v47, %v127_v42  ;;  %vm209_vm13 = vcmp.lt.s32.totalorder %v646_v51, 2  ;;  %v218_v52 = vsel %vm210_vm11, %v201_v44, %v217_v46 }
  0xac   :  { %v221_v57 = vsel %vm211_vm12, %v207_v53, 1326507024  ;;  %v212_v58 = vsel %vm208_vm10, %v192_v43, %v195_v33  ;;  %v214_v59 = vsel %vm210_vm11, %v198_v35, %v213_v55  ;;  %v219_v60 = vsel %vm209_vm13, %v216_v54, %v218_v52 }
  0xad   :  { %v222_v61 = vsel %vm210_vm11, %v204_v50, %v221_v57  ;;  %v133_v62 = vadd.s32 536870912, %v132_v56  ;;  %v670_v0 = vmul.u32.u64.low %v224_v41, %v219_v60  ;;  %v671_v1 = vmul.u32.u64.high %v224_v41, %v219_v60, %v670_v0 }
  0xae   :  { %v223_v63 = vsel %vm209_vm13, %v220_v49, %v222_v61  ;;  %v215_v5 = vsel %vm209_vm13, %v212_v58, %v214_v59  ;;  %v128_v21 = vadd.s32 %v659_v31, %v656_v30  ;;  %vm164_vm11 = vweird.f32 %v629_v27 }
  0xaf   :  { %v673_v2 = vmul.u32.u64.low %v224_v41, %v223_v63  ;;  %v674_v3 = vmul.u32.u64.high %v224_v41, %v223_v63, %v673_v2  ;;  %v134_v4 = vshrl.u32 %v133_v62, 30  ;;  %v234_v7 = vadd.s32 1, %v671_v1 }
  0xb0   :  { %v231_v51 = vmul.u32 %v224_v41, %v215_v5 }
  0xb1   :  { %v135_v6 = vshll.u32 %v134_v4, 30  ;;  %vm233_vm14 = vc.u32 %v674_v3, %v670_v0  ;;  %v232_v42 = vadd.s32 %v670_v0, %v674_v3  ;;  %v158_v47 = vsub.s32 4, %v134_v4 }
  0xb2   :  { %v235_v9 = vsel %vm233_vm14, %v234_v7, %v671_v1 }
  0xb3   :  { %v136_v8 = vsub.s32 %v132_v56, %v135_v6  ;;  %v236_v10 = vadd.s32 %v235_v9, %v231_v51  ;;  %v159_v57 = vsel %vm74_vm1, %v158_v47, %v134_v4 }
  0xb4   :  { %v161_v59 = vsel %vm73_vm2, 0, %v159_v57 }
  0xb5   :  { %v138_v11 = vsub.s32 0, %v136_v8  ;;  %v237_v12 = vadd.s32 536870912, %v236_v10  ;;  %v165_v29 = vadd.s32 3, %v161_v59  ;;  %v373_v2 = vand.u32 3, %v161_v59 }
  0xb7   :  { %v518_v13 = vmin.u32 %v138_v11, %v136_v8  ;;  %v238_v14 = vshrl.u32 %v237_v12, 30  ;;  %v166_v1 = vand.u32 3, %v165_v29  ;;  %vm375_vm6 = vcmp.eq.s32.totalorder %v373_v2, 0 }
  0xb8   :  { %vm378_vm7 = vcmp.eq.s32.totalorder %v373_v2, 2  ;;  %vm374_vm10 = vcmp.lt.s32.totalorder %v373_v2, 2 }
  0xb9   :  { %v140_v15 = vclz %v518_v13  ;;  %v239_v16 = vshll.u32 %v238_v14, 30  ;;  %v262_v61 = vsub.s32 4, %v238_v14  ;;  %vm171_vm5 = vcmp.eq.s32.totalorder %v166_v1, 2 }
  0xba   :  { %vm168_vm8 = vcmp.eq.s32.totalorder %v166_v1, 0  ;;  %vm167_vm9 = vcmp.lt.s32.totalorder %v166_v1, 2 }
  0xbb   :  { %v519_v17 = vadd.s32 4294967294, %v140_v15  ;;  %v240_v18 = vsub.s32 %v236_v10, %v239_v16  ;;  %v263_v0 = vsel %vm178_vm3, %v262_v61, %v238_v14 }
  0xbc   :  { %v265_v4 = vsel %vm177_vm4, 0, %v263_v0 }
  0xbd   :  { %vm520_vm15 = vcmp.lt.s32.totalorder %v519_v17, 0  ;;  %v242_v20 = vsub.s32 0, %v240_v18  ;;  %v476_v16 = vand.u32 3, %v265_v4 }
  0xbe   :  { %v143_v19 = vsel %vm520_vm15, 0, %v519_v17 }
  0xbf   :  { %v144_v22 = vsub.s32 32, %v143_v19  ;;  %v148_v23 = vsub.s32 4294967266, %v143_v19  ;;  %v522_v24 = vmin.u32 %v242_v20, %v240_v18  ;;  %v145_v25 = vshll.u32 %v136_v8, %v143_v19 }
  0xc0   :  { %v269_v8 = vadd.s32 3, %v265_v4  ;;  %vm481_vm13 = vcmp.eq.s32.totalorder %v476_v16, 2  ;;  %vm478_vm15 = vcmp.eq.s32.totalorder %v476_v16, 0 }
  0xc1   :  { %v146_v26 = vshrl.u32 %v128_v21, %v144_v22  ;;  %v149_v32 = vadd.s32 127, %v148_v23  ;;  %v244_v33 = vclz %v522_v24 }
  0xc2   :  { %v270_v15 = vand.u32 3, %v269_v8 }
  0xc3   :  { %v147_v35 = vor.u32 %v146_v26, %v145_v25  ;;  %v150_v36 = vshll.u32 %v149_v32, 23  ;;  %v523_v37 = vadd.s32 4294967294, %v244_v33 }
  0xc4   :  { %vm275_vm12 = vcmp.eq.s32.totalorder %v270_v15, 2  ;;  %vm272_vm14 = vcmp.eq.s32.totalorder %v270_v15, 0 }
  0xc5   :  { %v151_v38 = vor.u32 4788187, %v150_v36  ;;  %vm524_vm0 = vcmp.lt.s32.totalorder %v523_v37, 0  ;;  %v154_v40 = vcvt.s32.f32 %v147_v35 }
  0xc6   :  { %v247_v41 = vsel %vm524_vm0, 0, %v523_v37  ;;  %vm271_vm0 = vcmp.lt.s32.totalorder %v270_v15, 2 }
  0xc7   :  { %v152_v39 = vand.u32 2147483647, %v151_v38  ;;  %v248_v43 = vsub.s32 32, %v247_v41  ;;  %v252_v44 = vsub.s32 4294967266, %v247_v41  ;;  %v249_v31 = vshll.u32 %v240_v18, %v247_v41 }
  0xc9   :  { %v155_v30 = vmul.f32 %v154_v40, %v152_v39  ;;  %v250_v45 = vshrl.u32 %v232_v42, %v248_v43  ;;  %v253_v48 = vadd.s32 127, %v252_v44 }
  0xcb   :  { %v156_v50 = vxor.u32 2147483648, %v155_v30  ;;  %v251_v53 = vor.u32 %v250_v45, %v249_v31  ;;  %v254_v54 = vshll.u32 %v253_v48, 23 }
  0xcd   :  { %v157_v55 = vsel %vm74_vm1, %v156_v50, %v155_v30  ;;  %v255_v49 = vor.u32 4788187, %v254_v54  ;;  %v258_v52 = vcvt.s32.f32 %v251_v53  ;;  %vm477_vm1 = vcmp.lt.s32.totalorder %v476_v16, 2 }
  0xce   :  { %v160_v46 = vsel %vm73_vm2, %v629_v27, %v157_v55  ;;  %vm268_vm2 = vweird.f32 %v631_v28 }
  0xcf   :  { %561 = vcosq.f32 %v160_v46  ;;  %v256_v56 = vand.u32 2147483647, %v255_v49 }
  0xd0   :  { %563 = vsinq.f32 %v160_v46 }
  0xd1   :  { %v259_v58 = vmul.f32 %v258_v52, %v256_v56 }
  0xd3   :  { %v260_v60 = vxor.u32 2147483648, %v259_v58 }
  0xd5   :  { %v261_v62 = vsel %vm178_vm3, %v260_v60, %v259_v58  ;;  %vm494_vm3 = vcmask 326656  }
  0xd6   :  { %v264_v63 = vsel %vm177_vm4, %v631_v28, %v261_v62  ;;  %vm497_vm4 = vcmask 654336  }
  0xd7   :  { %565 = vcosq.f32 %v264_v63 }
  0xd8   :  { %567 = vsinq.f32 %v264_v63 }
  0xdc   :  { %v562_v3 = vpop.eup %561 }
  0xdd   :  { %v564_v5 = vpop.eup %563  ;;  %v172_v6 = vxor.u32 2147483648, %v562_v3 }
  0xde   :  { %v169_v7 = vxor.u32 2147483648, %v564_v5 }
  0xdf   :  { %v380_v51 = vsel %vm378_vm7, %v172_v6, %v564_v5  ;;  %v173_v34 = vsel %vm171_vm5, %v172_v6, %v564_v5 }
  0xe0   :  { %v377_v9 = vsel %vm375_vm6, %v562_v3, %v169_v7  ;;  %v170_v10 = vsel %vm168_vm8, %v562_v3, %v169_v7 }
  0xe1   :  { %v381_v11 = vsel %vm374_vm10, %v377_v9, %v380_v51  ;;  %v174_v12 = vsel %vm167_vm9, %v170_v10, %v173_v34 }
  0xe2   :  { %v382_v13 = vsel %vm164_vm11, nan, %v381_v11  ;;  %v175_v14 = vsel %vm164_vm11, nan, %v174_v12 }
  0xe3   :  { %488 = vrot.lane.b32.xlu1 %v382_v13, %s601_s0 }
  0xe4   :  { %v566_v17 = vpop.eup %565 }
  0xe5   :  { %v568_v18 = vpop.eup %567  ;;  %v276_v19 = vxor.u32 2147483648, %v566_v17 }
  0xe6   :  { %v273_v20 = vxor.u32 2147483648, %v568_v18 }
  0xe7   :  { %v483_v21 = vsel %vm481_vm13, %v276_v19, %v568_v18  ;;  %v277_v22 = vsel %vm275_vm12, %v276_v19, %v568_v18 }
  0xe8   :  { %v480_v27 = vsel %vm478_vm15, %v566_v17, %v273_v20  ;;  %v274_v23 = vsel %vm272_vm14, %v566_v17, %v273_v20 }
  0xe9   :  { %v484_v24 = vsel %vm477_vm1, %v480_v27, %v483_v21  ;;  %v278_v25 = vsel %vm271_vm0, %v274_v23, %v277_v22 }
  0xea   :  { %v485_v26 = vsel %vm268_vm2, nan, %v484_v24  ;;  %v279_v32 = vsel %vm268_vm2, nan, %v278_v25 }
  0xeb   :  { %490 = vrot.lane.b32.xlu1 %v485_v26, %s601_s0 }
 0x155   :  { %v489_v33 = vpop.permute.xlu1 %488 }
 0x156   :  { %v495_v35 = vsel %vm494_vm3, %v175_v14, %v489_v33 }
 0x157   :  { %498 = vst.msk [vmem:[#allocation2] sm:$0xff] %vm497_vm4, %v495_v35 }
 0x15d   :  { %v491_v36 = vpop.permute.xlu1 %490 }
 0x15e   :  { %v496_v37 = vsel %vm494_vm3, %v279_v32, %v491_v36 }
 0x15f   :  { %499 = vst.msk [vmem:[#allocation2 + $0x8] sm:$0xff] %vm497_vm4, %v496_v37 }
 0x160   :  { %580 = shalt.err (!%p577_p4)
}
 0x161   :  { %s603_s17 = smov 128   ;;  %s604_s18 = smov 8  }
 0x162   :  { %511 = dma.vmem_to_hbm [thread:$0]  %s506_s15, 256, %s696_s2, [#allocation3], %s603_s17, %s603_s17, %s604_s18  }
 0x163   :  { %589 = dma.done.wait [#allocation3], 256  }
 0x164   :  { %590 = vsyncadd [#allocation3], 4294967040 }
 0x165   :  { %515 = vsyncpa [#allocation3], 1 }

</bundles_post_ra>
